<compile_context>
chip_gen: v7x
topology: tpu7x:2x2x1
jax: 0.10.0
libtpu: 0.0.40
codegen_flags: <defaults>
</compile_context>

<pallas_src>
import functools

import jax
import jax.numpy as jnp
import numpy as np
from jax.experimental import pallas as pl
from jax.experimental.pallas import tpu as pltpu


# -------------------------------- kernel -----------------------------------


def yolo_loss_kernel(x_ref, out_ref, *, C, B, S, N, half,
                     w_box, w_conf, w_dist):
    # x_ref: (2, D, N, S*S) f32 in VMEM; x_ref[0, c] = pred channel c,
    #                                    x_ref[1, c] = tgt  channel c.
    # out_ref: (1, 128) f32; lanes 0..2 = [box_loss, conf_loss, distance_loss].
    n_cells = N * S * S

    def p(c):                     # pred channel c  -> (N, S*S)
        return x_ref[0, c, :, :]

    def t(c):                     # target channel c -> (N, S*S)
        return x_ref[1, c, :, :]

    exists = t(C)                                   # objectness indicator
    tx1, ty1, tx2, ty2 = t(C + 1), t(C + 2), t(C + 3), t(C + 4)

    def square(x1, y1, x2, y2):
        # square_results: recenter box to a fixed-size square of half-width `half`.
        cx = x1 + (x2 - x1) * 0.5
        cy = y1 + (y2 - y1) * 0.5
        return cx - half, cy - half, cx + half, cy + half

    def inter_den(bx1, by1, bx2, by2):
        ix1 = jnp.maximum(bx1, tx1)
        iy1 = jnp.maximum(by1, ty1)
        ix2 = jnp.minimum(bx2, tx2)
        iy2 = jnp.minimum(by2, ty2)
        inter = jnp.maximum(ix2 - ix1, 0.0) * jnp.maximum(iy2 - iy1, 0.0)
        area = jnp.abs((bx2 - bx1) * (by2 - by1))
        tarea = jnp.abs((tx2 - tx1) * (ty2 - ty1))
        return inter, area + tarea - inter + 1e-6   # denominator > 0 always

    b1 = square(p(C + 1), p(C + 2), p(C + 3), p(C + 4))
    if B >= 2:
        b2 = square(p(C + 6), p(C + 7), p(C + 8), p(C + 9))
        i1, d1 = inter_den(*b1)
        i2, d2 = inter_den(*b2)
        # iou2 > iou1  <=>  i2*d1 > i1*d2  (both denominators strictly > 0);
        # ties pick box 1 (matches torch.max argmax behavior).
        best2 = (i2 * d1) > (i1 * d2)
        bp = tuple(jnp.where(best2, v2, v1) for v1, v2 in zip(b1, b2))
        conf = jnp.where(best2, p(C + 5), p(C))
    else:
        bp = b1
        conf = p(C)

    bp = tuple(exists * v for v in bp)              # masked predicted box
    bt = tuple(exists * v for v in (tx1, ty1, tx2, ty2))   # masked target box

    # ---- box loss: total SSE over 4 coords and all N*S*S cells ----
    e_box = sum((a - b) ** 2 for a, b in zip(bp, bt))          # (N, S*S)
    box_sse = jnp.sum(jnp.sum(e_box, axis=-1, keepdims=True),
                      axis=0, keepdims=True)                   # (1, 1)
    box_loss = box_sse * (w_box / n_cells)

    # ---- conf loss ----
    e_conf = (exists * (conf - exists)) ** 2                   # (N, S*S)
    conf_sse = jnp.sum(jnp.sum(e_conf, axis=-1, keepdims=True),
                       axis=0, keepdims=True)                  # (1, 1)
    conf_loss = conf_sse * (w_conf / n_cells)

    # ---- distance loss: per-batch summed boxes -> midpoints -> L2 ----
    pb = [jnp.sum(v, axis=-1, keepdims=True) for v in bp]      # 4 x (N, 1)
    tb = [jnp.sum(v, axis=-1, keepdims=True) for v in bt]      # 4 x (N, 1)
    ppx = pb[0] + (pb[2] - pb[0]) * 0.5
    ppy = pb[1] + (pb[3] - pb[1]) * 0.5
    tpx = tb[0] + (tb[2] - tb[0]) * 0.5
    tpy = tb[1] + (tb[3] - tb[1]) * 0.5
    # torch.nn.PairwiseDistance(p=2): ||x1 - x2 + eps||_2, eps = 1e-6
    dx = ppx - tpx + 1e-6
    dy = ppy - tpy + 1e-6
    dist = jnp.sqrt(dx * dx + dy * dy)                         # (N, 1)
    dist_loss = jnp.sum(dist, axis=0, keepdims=True) * (w_dist / N)  # (1, 1)

    # ---- single lane-dense output row ----
    lane = jax.lax.broadcasted_iota(jnp.int32, (1, 128), 1)
    row = jnp.where(lane == 0, box_loss, 0.0)
    row = jnp.where(lane == 1, conf_loss, row)
    row = jnp.where(lane == 2, dist_loss, row)
    out_ref[...] = row


# ------------------------------- wrapper ------------------------------------


def yolo_loss(predictions, target, *, S, B, C, bbox_w, img_width,
              w_box_loss, w_conf_loss, w_euclidian_loss):
    D = C + B * 5
    if target.ndim == 5:
        target = target.reshape((-1,) + target.shape[2:])
    pred = predictions.reshape(-1, S * S, D).astype(jnp.float32)
    tgt = target.reshape(-1, S * S, D).astype(jnp.float32)
    N = pred.shape[0]
    half = float(bbox_w) / float(img_width)

    # One stacked, channels-on-rows / cells-on-lanes input: (2, D, N, S*S).
    x = jnp.transpose(jnp.stack([pred, tgt], axis=0), (0, 3, 1, 2))

    kernel = functools.partial(
        yolo_loss_kernel, C=C, B=B, S=S, N=N, half=half,
        w_box=float(w_box_loss), w_conf=float(w_conf_loss),
        w_dist=float(w_euclidian_loss))

    vmem = pl.BlockSpec(memory_space=pltpu.MemorySpace.VMEM)
    out = pl.pallas_call(
        kernel,
        out_shape=jax.ShapeDtypeStruct((1, 128), jnp.float32),
        in_specs=[vmem],
        out_specs=vmem,
    )(x)

    return {
        "box_loss": out[0, 0],
        "conf_loss": out[0, 1],
        "distance_loss": out[0, 2],
    }


# --------------------------- pure-numpy reference ---------------------------


def yolo_loss_ref(predictions, target, *, S, B, C, bbox_w, img_width,
                  w_box_loss, w_conf_loss, w_euclidian_loss):
    pred = np.array(predictions, dtype=np.float32).reshape(-1, S, S, C + B * 5)
    tgt = np.array(target, dtype=np.float32)
    if tgt.ndim == 5:
        tgt = tgt.reshape((-1,) + tgt.shape[2:])
    half = float(bbox_w) / float(img_width)

    def square(b):
        pt = b[..., :2] + (b[..., 2:] - b[..., :2]) / 2.0
        return np.concatenate([pt - half, pt + half], axis=-1)

    def iou(b1, b2):
        x1 = np.maximum(b1[..., 0:1], b2[..., 0:1]); y1 = np.maximum(b1[..., 1:2], b2[..., 1:2])
        x2 = np.minimum(b1[..., 2:3], b2[..., 2:3]); y2 = np.minimum(b1[..., 3:4], b2[..., 3:4])
        inter = np.clip(x2 - x1, 0, None) * np.clip(y2 - y1, 0, None)
        a1 = np.abs((b1[..., 2:3] - b1[..., 0:1]) * (b1[..., 3:4] - b1[..., 1:2]))
        a2 = np.abs((b2[..., 2:3] - b2[..., 0:1]) * (b2[..., 3:4] - b2[..., 1:2]))
        return inter / (a1 + a2 - inter + 1e-6)

    pred[..., C + 1:C + 5] = square(pred[..., C + 1:C + 5])
    iou1 = iou(pred[..., C + 1:C + 5], tgt[..., C + 1:C + 5])
    exists = tgt[..., C:C + 1]
    box_t = exists * tgt[..., C + 1:C + 5]
    if B == 2:
        pred[..., C + 6:C + 10] = square(pred[..., C + 6:C + 10])
        iou2 = iou(pred[..., C + 6:C + 10], tgt[..., C + 1:C + 5])
        best = (iou2 > iou1).astype(np.float32)
        box_p = exists * (best * pred[..., C + 6:C + 10] + (1 - best) * pred[..., C + 1:C + 5])
        conf = best * pred[..., C + 5:C + 6] + (1 - best) * pred[..., C:C + 1]
    else:
        box_p = exists * pred[..., C + 1:C + 5]
        conf = pred[..., C:C + 1]

    box_loss = ((box_p - box_t) ** 2).reshape(-1, 4).sum(1).mean()
    conf_loss = ((exists * conf - exists * tgt[..., C:C + 1]) ** 2).mean()
    pb = box_p.sum(-2).sum(-2); tb = box_t.sum(-2).sum(-2)
    pp = pb[..., :2] + (pb[..., 2:] - pb[..., :2]) / 2.0
    tp = tb[..., :2] + (tb[..., 2:] - tb[..., :2]) / 2.0
    dist = np.sqrt(((pp - tp + 1e-6) ** 2).sum(-1)).mean()
    return {
        "box_loss": box_loss * w_box_loss,
        "conf_loss": conf_loss * w_conf_loss,
        "distance_loss": dist * w_euclidian_loss,
    }


# ---------------------------------- main ------------------------------------


if __name__ == "__main__":
    # synthetic config (small shapes); YoloLoss has no learnable parameters
    S, B, C = 4, 2, 3
    D = C + B * 5                      # 13
    N = 2
    cfg = dict(S=S, B=B, C=C, bbox_w=20.0, img_width=160.0,
               w_box_loss=5.0, w_conf_loss=0.5, w_euclidian_loss=1.0)

    key = jax.random.PRNGKey(0)
    k1, k2, k3, k4 = jax.random.split(key, 4)

    # raw network output (will be reshaped to (N, S, S, D) inside the loss)
    predictions = jax.random.normal(k1, (N, S * S * D), dtype=jnp.float32)

    # target: [class probs | objectness in {0,1} | box corners in [0,1] | zeros]
    tgt_cls = jax.random.uniform(k2, (N, S, S, C), dtype=jnp.float32)
    tgt_obj = (jax.random.uniform(k3, (N, S, S, 1)) > 0.7).astype(jnp.float32)
    tgt_box = jax.random.uniform(k4, (N, S, S, 4), dtype=jnp.float32)
    tgt_rest = jnp.zeros((N, S, S, D - C - 5), dtype=jnp.float32)
    target = jnp.concatenate([tgt_cls, tgt_obj, tgt_box, tgt_rest], axis=-1)

    loss_fn = jax.jit(functools.partial(yolo_loss, **cfg))
    loss = loss_fn(predictions, target)
    loss = jax.block_until_ready(loss)

    ref = yolo_loss_ref(predictions, target, **cfg)
    for k in ("box_loss", "conf_loss", "distance_loss"):
        np.testing.assert_allclose(np.array(loss[k]), np.array(ref[k]),
                                   rtol=1e-4, atol=1e-4)

    print("KERNEL_OK")
</pallas_src>

<mosaic_0001>
module attributes {stable_mosaic.version = 11 : i64} {
  func.func @yolo_loss_kernel(%arg0: memref<2x13x2x16xf32, #tpu.memory_space<vmem>>, %arg1: memref<1x128xf32, #tpu.memory_space<vmem>>) attributes {dimension_semantics = [], scalar_prefetch = 0 : i64, scratch_operands = 0 : i64, tpu.core_type = #tpu.core_type<tc>} {
    %c1 = arith.constant 1 : index
    %c3 = arith.constant 3 : index
    %c0 = arith.constant 0 : index
    %c0_0 = arith.constant 0 : index
    %0 = vector.load %arg0[%c1, %c3, %c0, %c0_0] : memref<2x13x2x16xf32, #tpu.memory_space<vmem>>, vector<1x1x2x16xf32>
    %1 = vector.shape_cast %0 : vector<1x1x2x16xf32> to vector<2x16xf32>
    %c1_1 = arith.constant 1 : index
    %c4 = arith.constant 4 : index
    %c0_2 = arith.constant 0 : index
    %c0_3 = arith.constant 0 : index
    %2 = vector.load %arg0[%c1_1, %c4, %c0_2, %c0_3] : memref<2x13x2x16xf32, #tpu.memory_space<vmem>>, vector<1x1x2x16xf32>
    %3 = vector.shape_cast %2 : vector<1x1x2x16xf32> to vector<2x16xf32>
    %c1_4 = arith.constant 1 : index
    %c5 = arith.constant 5 : index
    %c0_5 = arith.constant 0 : index
    %c0_6 = arith.constant 0 : index
    %4 = vector.load %arg0[%c1_4, %c5, %c0_5, %c0_6] : memref<2x13x2x16xf32, #tpu.memory_space<vmem>>, vector<1x1x2x16xf32>
    %5 = vector.shape_cast %4 : vector<1x1x2x16xf32> to vector<2x16xf32>
    %c1_7 = arith.constant 1 : index
    %c6 = arith.constant 6 : index
    %c0_8 = arith.constant 0 : index
    %c0_9 = arith.constant 0 : index
    %6 = vector.load %arg0[%c1_7, %c6, %c0_8, %c0_9] : memref<2x13x2x16xf32, #tpu.memory_space<vmem>>, vector<1x1x2x16xf32>
    %7 = vector.shape_cast %6 : vector<1x1x2x16xf32> to vector<2x16xf32>
    %c1_10 = arith.constant 1 : index
    %c7 = arith.constant 7 : index
    %c0_11 = arith.constant 0 : index
    %c0_12 = arith.constant 0 : index
    %8 = vector.load %arg0[%c1_10, %c7, %c0_11, %c0_12] : memref<2x13x2x16xf32, #tpu.memory_space<vmem>>, vector<1x1x2x16xf32>
    %9 = vector.shape_cast %8 : vector<1x1x2x16xf32> to vector<2x16xf32>
    %c0_13 = arith.constant 0 : index
    %c4_14 = arith.constant 4 : index
    %c0_15 = arith.constant 0 : index
    %c0_16 = arith.constant 0 : index
    %10 = vector.load %arg0[%c0_13, %c4_14, %c0_15, %c0_16] : memref<2x13x2x16xf32, #tpu.memory_space<vmem>>, vector<1x1x2x16xf32>
    %11 = vector.shape_cast %10 : vector<1x1x2x16xf32> to vector<2x16xf32>
    %c0_17 = arith.constant 0 : index
    %c5_18 = arith.constant 5 : index
    %c0_19 = arith.constant 0 : index
    %c0_20 = arith.constant 0 : index
    %12 = vector.load %arg0[%c0_17, %c5_18, %c0_19, %c0_20] : memref<2x13x2x16xf32, #tpu.memory_space<vmem>>, vector<1x1x2x16xf32>
    %13 = vector.shape_cast %12 : vector<1x1x2x16xf32> to vector<2x16xf32>
    %c0_21 = arith.constant 0 : index
    %c6_22 = arith.constant 6 : index
    %c0_23 = arith.constant 0 : index
    %c0_24 = arith.constant 0 : index
    %14 = vector.load %arg0[%c0_21, %c6_22, %c0_23, %c0_24] : memref<2x13x2x16xf32, #tpu.memory_space<vmem>>, vector<1x1x2x16xf32>
    %15 = vector.shape_cast %14 : vector<1x1x2x16xf32> to vector<2x16xf32>
    %c0_25 = arith.constant 0 : index
    %c7_26 = arith.constant 7 : index
    %c0_27 = arith.constant 0 : index
    %c0_28 = arith.constant 0 : index
    %16 = vector.load %arg0[%c0_25, %c7_26, %c0_27, %c0_28] : memref<2x13x2x16xf32, #tpu.memory_space<vmem>>, vector<1x1x2x16xf32>
    %17 = vector.shape_cast %16 : vector<1x1x2x16xf32> to vector<2x16xf32>
    %18 = arith.subf %15, %11 : vector<2x16xf32>
    %cst = arith.constant 5.000000e-01 : f32
    %19 = vector.broadcast %cst : f32 to vector<2x16xf32>
    %20 = arith.mulf %18, %19 : vector<2x16xf32>
    %21 = arith.addf %11, %20 : vector<2x16xf32>
    %22 = arith.subf %17, %13 : vector<2x16xf32>
    %cst_29 = arith.constant 5.000000e-01 : f32
    %23 = vector.broadcast %cst_29 : f32 to vector<2x16xf32>
    %24 = arith.mulf %22, %23 : vector<2x16xf32>
    %25 = arith.addf %13, %24 : vector<2x16xf32>
    %cst_30 = arith.constant 1.250000e-01 : f32
    %26 = vector.broadcast %cst_30 : f32 to vector<2x16xf32>
    %27 = arith.subf %21, %26 : vector<2x16xf32>
    %cst_31 = arith.constant 1.250000e-01 : f32
    %28 = vector.broadcast %cst_31 : f32 to vector<2x16xf32>
    %29 = arith.subf %25, %28 : vector<2x16xf32>
    %cst_32 = arith.constant 1.250000e-01 : f32
    %30 = vector.broadcast %cst_32 : f32 to vector<2x16xf32>
    %31 = arith.addf %21, %30 : vector<2x16xf32>
    %cst_33 = arith.constant 1.250000e-01 : f32
    %32 = vector.broadcast %cst_33 : f32 to vector<2x16xf32>
    %33 = arith.addf %25, %32 : vector<2x16xf32>
    %c0_34 = arith.constant 0 : index
    %c9 = arith.constant 9 : index
    %c0_35 = arith.constant 0 : index
    %c0_36 = arith.constant 0 : index
    %34 = vector.load %arg0[%c0_34, %c9, %c0_35, %c0_36] : memref<2x13x2x16xf32, #tpu.memory_space<vmem>>, vector<1x1x2x16xf32>
    %35 = vector.shape_cast %34 : vector<1x1x2x16xf32> to vector<2x16xf32>
    %c0_37 = arith.constant 0 : index
    %c10 = arith.constant 10 : index
    %c0_38 = arith.constant 0 : index
    %c0_39 = arith.constant 0 : index
    %36 = vector.load %arg0[%c0_37, %c10, %c0_38, %c0_39] : memref<2x13x2x16xf32, #tpu.memory_space<vmem>>, vector<1x1x2x16xf32>
    %37 = vector.shape_cast %36 : vector<1x1x2x16xf32> to vector<2x16xf32>
    %c0_40 = arith.constant 0 : index
    %c11 = arith.constant 11 : index
    %c0_41 = arith.constant 0 : index
    %c0_42 = arith.constant 0 : index
    %38 = vector.load %arg0[%c0_40, %c11, %c0_41, %c0_42] : memref<2x13x2x16xf32, #tpu.memory_space<vmem>>, vector<1x1x2x16xf32>
    %39 = vector.shape_cast %38 : vector<1x1x2x16xf32> to vector<2x16xf32>
    %c0_43 = arith.constant 0 : index
    %c12 = arith.constant 12 : index
    %c0_44 = arith.constant 0 : index
    %c0_45 = arith.constant 0 : index
    %40 = vector.load %arg0[%c0_43, %c12, %c0_44, %c0_45] : memref<2x13x2x16xf32, #tpu.memory_space<vmem>>, vector<1x1x2x16xf32>
    %41 = vector.shape_cast %40 : vector<1x1x2x16xf32> to vector<2x16xf32>
    %42 = arith.subf %39, %35 : vector<2x16xf32>
    %cst_46 = arith.constant 5.000000e-01 : f32
    %43 = vector.broadcast %cst_46 : f32 to vector<2x16xf32>
    %44 = arith.mulf %42, %43 : vector<2x16xf32>
    %45 = arith.addf %35, %44 : vector<2x16xf32>
    %46 = arith.subf %41, %37 : vector<2x16xf32>
    %cst_47 = arith.constant 5.000000e-01 : f32
    %47 = vector.broadcast %cst_47 : f32 to vector<2x16xf32>
    %48 = arith.mulf %46, %47 : vector<2x16xf32>
    %49 = arith.addf %37, %48 : vector<2x16xf32>
    %cst_48 = arith.constant 1.250000e-01 : f32
    %50 = vector.broadcast %cst_48 : f32 to vector<2x16xf32>
    %51 = arith.subf %45, %50 : vector<2x16xf32>
    %cst_49 = arith.constant 1.250000e-01 : f32
    %52 = vector.broadcast %cst_49 : f32 to vector<2x16xf32>
    %53 = arith.subf %49, %52 : vector<2x16xf32>
    %cst_50 = arith.constant 1.250000e-01 : f32
    %54 = vector.broadcast %cst_50 : f32 to vector<2x16xf32>
    %55 = arith.addf %45, %54 : vector<2x16xf32>
    %cst_51 = arith.constant 1.250000e-01 : f32
    %56 = vector.broadcast %cst_51 : f32 to vector<2x16xf32>
    %57 = arith.addf %49, %56 : vector<2x16xf32>
    %58 = arith.maximumf %27, %3 : vector<2x16xf32>
    %59 = arith.maximumf %29, %5 : vector<2x16xf32>
    %60 = arith.minimumf %31, %7 : vector<2x16xf32>
    %61 = arith.minimumf %33, %9 : vector<2x16xf32>
    %62 = arith.subf %60, %58 : vector<2x16xf32>
    %cst_52 = arith.constant 0.000000e+00 : f32
    %63 = vector.broadcast %cst_52 : f32 to vector<2x16xf32>
    %64 = arith.maximumf %62, %63 : vector<2x16xf32>
    %65 = arith.subf %61, %59 : vector<2x16xf32>
    %cst_53 = arith.constant 0.000000e+00 : f32
    %66 = vector.broadcast %cst_53 : f32 to vector<2x16xf32>
    %67 = arith.maximumf %65, %66 : vector<2x16xf32>
    %68 = arith.mulf %64, %67 : vector<2x16xf32>
    %69 = arith.subf %31, %27 : vector<2x16xf32>
    %70 = arith.subf %33, %29 : vector<2x16xf32>
    %71 = arith.mulf %69, %70 : vector<2x16xf32>
    %72 = math.absf %71 : vector<2x16xf32>
    %73 = arith.subf %7, %3 : vector<2x16xf32>
    %74 = arith.subf %9, %5 : vector<2x16xf32>
    %75 = arith.mulf %73, %74 : vector<2x16xf32>
    %76 = math.absf %75 : vector<2x16xf32>
    %77 = arith.addf %72, %76 : vector<2x16xf32>
    %78 = arith.subf %77, %68 : vector<2x16xf32>
    %cst_54 = arith.constant 9.99999997E-7 : f32
    %79 = vector.broadcast %cst_54 : f32 to vector<2x16xf32>
    %80 = arith.addf %78, %79 : vector<2x16xf32>
    %81 = arith.maximumf %51, %3 : vector<2x16xf32>
    %82 = arith.maximumf %53, %5 : vector<2x16xf32>
    %83 = arith.minimumf %55, %7 : vector<2x16xf32>
    %84 = arith.minimumf %57, %9 : vector<2x16xf32>
    %85 = arith.subf %83, %81 : vector<2x16xf32>
    %cst_55 = arith.constant 0.000000e+00 : f32
    %86 = vector.broadcast %cst_55 : f32 to vector<2x16xf32>
    %87 = arith.maximumf %85, %86 : vector<2x16xf32>
    %88 = arith.subf %84, %82 : vector<2x16xf32>
    %cst_56 = arith.constant 0.000000e+00 : f32
    %89 = vector.broadcast %cst_56 : f32 to vector<2x16xf32>
    %90 = arith.maximumf %88, %89 : vector<2x16xf32>
    %91 = arith.mulf %87, %90 : vector<2x16xf32>
    %92 = arith.subf %55, %51 : vector<2x16xf32>
    %93 = arith.subf %57, %53 : vector<2x16xf32>
    %94 = arith.mulf %92, %93 : vector<2x16xf32>
    %95 = math.absf %94 : vector<2x16xf32>
    %96 = arith.subf %7, %3 : vector<2x16xf32>
    %97 = arith.subf %9, %5 : vector<2x16xf32>
    %98 = arith.mulf %96, %97 : vector<2x16xf32>
    %99 = math.absf %98 : vector<2x16xf32>
    %100 = arith.addf %95, %99 : vector<2x16xf32>
    %101 = arith.subf %100, %91 : vector<2x16xf32>
    %cst_57 = arith.constant 9.99999997E-7 : f32
    %102 = vector.broadcast %cst_57 : f32 to vector<2x16xf32>
    %103 = arith.addf %101, %102 : vector<2x16xf32>
    %104 = arith.mulf %91, %80 : vector<2x16xf32>
    %105 = arith.mulf %68, %103 : vector<2x16xf32>
    %106 = arith.cmpf ogt, %104, %105 : vector<2x16xf32>
    %107 = arith.select %106, %51, %27 : vector<2x16xi1>, vector<2x16xf32>
    %108 = arith.select %106, %53, %29 : vector<2x16xi1>, vector<2x16xf32>
    %109 = arith.select %106, %55, %31 : vector<2x16xi1>, vector<2x16xf32>
    %110 = arith.select %106, %57, %33 : vector<2x16xi1>, vector<2x16xf32>
    %c0_58 = arith.constant 0 : index
    %c8 = arith.constant 8 : index
    %c0_59 = arith.constant 0 : index
    %c0_60 = arith.constant 0 : index
    %111 = vector.load %arg0[%c0_58, %c8, %c0_59, %c0_60] : memref<2x13x2x16xf32, #tpu.memory_space<vmem>>, vector<1x1x2x16xf32>
    %112 = vector.shape_cast %111 : vector<1x1x2x16xf32> to vector<2x16xf32>
    %c0_61 = arith.constant 0 : index
    %c3_62 = arith.constant 3 : index
    %c0_63 = arith.constant 0 : index
    %c0_64 = arith.constant 0 : index
    %113 = vector.load %arg0[%c0_61, %c3_62, %c0_63, %c0_64] : memref<2x13x2x16xf32, #tpu.memory_space<vmem>>, vector<1x1x2x16xf32>
    %114 = vector.shape_cast %113 : vector<1x1x2x16xf32> to vector<2x16xf32>
    %115 = arith.select %106, %112, %114 : vector<2x16xi1>, vector<2x16xf32>
    %116 = arith.mulf %1, %107 : vector<2x16xf32>
    %117 = arith.mulf %1, %108 : vector<2x16xf32>
    %118 = arith.mulf %1, %109 : vector<2x16xf32>
    %119 = arith.mulf %1, %110 : vector<2x16xf32>
    %120 = arith.mulf %1, %3 : vector<2x16xf32>
    %121 = arith.mulf %1, %5 : vector<2x16xf32>
    %122 = arith.mulf %1, %7 : vector<2x16xf32>
    %123 = arith.mulf %1, %9 : vector<2x16xf32>
    %124 = arith.subf %116, %120 : vector<2x16xf32>
    %125 = arith.mulf %124, %124 : vector<2x16xf32>
    %cst_65 = arith.constant 0.000000e+00 : f32
    %126 = vector.broadcast %cst_65 : f32 to vector<2x16xf32>
    %127 = arith.addf %126, %125 : vector<2x16xf32>
    %128 = arith.subf %117, %121 : vector<2x16xf32>
    %129 = arith.mulf %128, %128 : vector<2x16xf32>
    %130 = arith.addf %127, %129 : vector<2x16xf32>
    %131 = arith.subf %118, %122 : vector<2x16xf32>
    %132 = arith.mulf %131, %131 : vector<2x16xf32>
    %133 = arith.addf %130, %132 : vector<2x16xf32>
    %134 = arith.subf %119, %123 : vector<2x16xf32>
    %135 = arith.mulf %134, %134 : vector<2x16xf32>
    %136 = arith.addf %133, %135 : vector<2x16xf32>
    %cst_66 = arith.constant dense<0.000000e+00> : vector<2xf32>
    %137 = vector.multi_reduction <add>, %136, %cst_66 [1] : vector<2x16xf32> to vector<2xf32>
    %138 = vector.shape_cast %137 : vector<2xf32> to vector<2x1xf32>
    %cst_67 = arith.constant dense<0.000000e+00> : vector<1xf32>
    %139 = vector.multi_reduction <add>, %138, %cst_67 [0] : vector<2x1xf32> to vector<1xf32>
    %140 = vector.shape_cast %139 : vector<1xf32> to vector<1x1xf32>
    %cst_68 = arith.constant 1.562500e-01 : f32
    %141 = vector.broadcast %cst_68 : f32 to vector<1x1xf32>
    %142 = arith.mulf %140, %141 : vector<1x1xf32>
    %143 = arith.subf %115, %1 : vector<2x16xf32>
    %144 = arith.mulf %1, %143 : vector<2x16xf32>
    %145 = arith.mulf %144, %144 : vector<2x16xf32>
    %cst_69 = arith.constant dense<0.000000e+00> : vector<2xf32>
    %146 = vector.multi_reduction <add>, %145, %cst_69 [1] : vector<2x16xf32> to vector<2xf32>
    %147 = vector.shape_cast %146 : vector<2xf32> to vector<2x1xf32>
    %cst_70 = arith.constant dense<0.000000e+00> : vector<1xf32>
    %148 = vector.multi_reduction <add>, %147, %cst_70 [0] : vector<2x1xf32> to vector<1xf32>
    %149 = vector.shape_cast %148 : vector<1xf32> to vector<1x1xf32>
    %cst_71 = arith.constant 1.562500e-02 : f32
    %150 = vector.broadcast %cst_71 : f32 to vector<1x1xf32>
    %151 = arith.mulf %149, %150 : vector<1x1xf32>
    %cst_72 = arith.constant dense<0.000000e+00> : vector<2xf32>
    %152 = vector.multi_reduction <add>, %116, %cst_72 [1] : vector<2x16xf32> to vector<2xf32>
    %153 = vector.shape_cast %152 : vector<2xf32> to vector<2x1xf32>
    %cst_73 = arith.constant dense<0.000000e+00> : vector<2xf32>
    %154 = vector.multi_reduction <add>, %117, %cst_73 [1] : vector<2x16xf32> to vector<2xf32>
    %155 = vector.shape_cast %154 : vector<2xf32> to vector<2x1xf32>
    %cst_74 = arith.constant dense<0.000000e+00> : vector<2xf32>
    %156 = vector.multi_reduction <add>, %118, %cst_74 [1] : vector<2x16xf32> to vector<2xf32>
    %157 = vector.shape_cast %156 : vector<2xf32> to vector<2x1xf32>
    %cst_75 = arith.constant dense<0.000000e+00> : vector<2xf32>
    %158 = vector.multi_reduction <add>, %119, %cst_75 [1] : vector<2x16xf32> to vector<2xf32>
    %159 = vector.shape_cast %158 : vector<2xf32> to vector<2x1xf32>
    %cst_76 = arith.constant dense<0.000000e+00> : vector<2xf32>
    %160 = vector.multi_reduction <add>, %120, %cst_76 [1] : vector<2x16xf32> to vector<2xf32>
    %161 = vector.shape_cast %160 : vector<2xf32> to vector<2x1xf32>
    %cst_77 = arith.constant dense<0.000000e+00> : vector<2xf32>
    %162 = vector.multi_reduction <add>, %121, %cst_77 [1] : vector<2x16xf32> to vector<2xf32>
    %163 = vector.shape_cast %162 : vector<2xf32> to vector<2x1xf32>
    %cst_78 = arith.constant dense<0.000000e+00> : vector<2xf32>
    %164 = vector.multi_reduction <add>, %122, %cst_78 [1] : vector<2x16xf32> to vector<2xf32>
    %165 = vector.shape_cast %164 : vector<2xf32> to vector<2x1xf32>
    %cst_79 = arith.constant dense<0.000000e+00> : vector<2xf32>
    %166 = vector.multi_reduction <add>, %123, %cst_79 [1] : vector<2x16xf32> to vector<2xf32>
    %167 = vector.shape_cast %166 : vector<2xf32> to vector<2x1xf32>
    %168 = arith.subf %157, %153 : vector<2x1xf32>
    %cst_80 = arith.constant 5.000000e-01 : f32
    %169 = vector.broadcast %cst_80 : f32 to vector<2x1xf32>
    %170 = arith.mulf %168, %169 : vector<2x1xf32>
    %171 = arith.addf %153, %170 : vector<2x1xf32>
    %172 = arith.subf %159, %155 : vector<2x1xf32>
    %cst_81 = arith.constant 5.000000e-01 : f32
    %173 = vector.broadcast %cst_81 : f32 to vector<2x1xf32>
    %174 = arith.mulf %172, %173 : vector<2x1xf32>
    %175 = arith.addf %155, %174 : vector<2x1xf32>
    %176 = arith.subf %165, %161 : vector<2x1xf32>
    %cst_82 = arith.constant 5.000000e-01 : f32
    %177 = vector.broadcast %cst_82 : f32 to vector<2x1xf32>
    %178 = arith.mulf %176, %177 : vector<2x1xf32>
    %179 = arith.addf %161, %178 : vector<2x1xf32>
    %180 = arith.subf %167, %163 : vector<2x1xf32>
    %cst_83 = arith.constant 5.000000e-01 : f32
    %181 = vector.broadcast %cst_83 : f32 to vector<2x1xf32>
    %182 = arith.mulf %180, %181 : vector<2x1xf32>
    %183 = arith.addf %163, %182 : vector<2x1xf32>
    %184 = arith.subf %171, %179 : vector<2x1xf32>
    %cst_84 = arith.constant 9.99999997E-7 : f32
    %185 = vector.broadcast %cst_84 : f32 to vector<2x1xf32>
    %186 = arith.addf %184, %185 : vector<2x1xf32>
    %187 = arith.subf %175, %183 : vector<2x1xf32>
    %cst_85 = arith.constant 9.99999997E-7 : f32
    %188 = vector.broadcast %cst_85 : f32 to vector<2x1xf32>
    %189 = arith.addf %187, %188 : vector<2x1xf32>
    %190 = arith.mulf %186, %186 : vector<2x1xf32>
    %191 = arith.mulf %189, %189 : vector<2x1xf32>
    %192 = arith.addf %190, %191 : vector<2x1xf32>
    %193 = math.sqrt %192 : vector<2x1xf32>
    %cst_86 = arith.constant dense<0.000000e+00> : vector<1xf32>
    %194 = vector.multi_reduction <add>, %193, %cst_86 [0] : vector<2x1xf32> to vector<1xf32>
    %195 = vector.shape_cast %194 : vector<1xf32> to vector<1x1xf32>
    %cst_87 = arith.constant 5.000000e-01 : f32
    %196 = vector.broadcast %cst_87 : f32 to vector<1x1xf32>
    %197 = arith.mulf %195, %196 : vector<1x1xf32>
    %198 = tpu.iota {dimensions = array<i32: 1>} : vector<1x128xi32>
    %c0_i32 = arith.constant 0 : i32
    %199 = vector.broadcast %c0_i32 : i32 to vector<1x128xi32>
    %200 = arith.cmpi eq, %198, %199 : vector<1x128xi32>
    %cst_88 = arith.constant 0.000000e+00 : f32
    %201 = vector.shape_cast %142 : vector<1x1xf32> to vector<1x1xf32>
    %202 = vector.broadcast %201 : vector<1x1xf32> to vector<1x128xf32>
    %203 = vector.broadcast %cst_88 : f32 to vector<1x128xf32>
    %204 = arith.select %200, %202, %203 : vector<1x128xi1>, vector<1x128xf32>
    %c1_i32 = arith.constant 1 : i32
    %205 = vector.broadcast %c1_i32 : i32 to vector<1x128xi32>
    %206 = arith.cmpi eq, %198, %205 : vector<1x128xi32>
    %207 = vector.shape_cast %151 : vector<1x1xf32> to vector<1x1xf32>
    %208 = vector.broadcast %207 : vector<1x1xf32> to vector<1x128xf32>
    %209 = arith.select %206, %208, %204 : vector<1x128xi1>, vector<1x128xf32>
    %c2_i32 = arith.constant 2 : i32
    %210 = vector.broadcast %c2_i32 : i32 to vector<1x128xi32>
    %211 = arith.cmpi eq, %198, %210 : vector<1x128xi32>
    %212 = vector.shape_cast %197 : vector<1x1xf32> to vector<1x1xf32>
    %213 = vector.broadcast %212 : vector<1x1xf32> to vector<1x128xf32>
    %214 = arith.select %211, %213, %209 : vector<1x128xi1>, vector<1x128xf32>
    %c0_89 = arith.constant 0 : index
    %c0_90 = arith.constant 0 : index
    %215 = vector.load %arg1[%c0_89, %c0_90] : memref<1x128xf32, #tpu.memory_space<vmem>>, vector<1x128xf32>
    tpu.vector_store %arg1[%c0_89, %c0_90], %214 {strides = array<i32>} : memref<1x128xf32, #tpu.memory_space<vmem>>, vector<1x128xf32>,
    return
  }
}

</mosaic_0001>

<bundles_post_ra>
// kernel: yolo_loss.1
= control target key start
LH: loop header
LB: loop body
LE: loop exit
PB: predicated region body
PF: predicated region fallthrough
CT: control target
= control target key end

     0   :  { %vm122_vm0 = vcmask 123904   ;;  %vm126_vm2 = vcmask 1041408   ;;  %s358_s0 = inlined_call_operand.vmem [shape: f32[2,13,2,16], index: 0, kind: input, shape index: {}]   ;;  %s359_s1 = inlined_call_operand.vmem [shape: f32[1,128], index: 1, kind: output, shape index: {}]  }
   0x1   :  { %v254_v0 = vld [vmem:[%s358_s0 + $0x20] sm:$0x3]  ;;  %v222_v1 = vld [vmem:[%s358_s0 + $0x24] sm:$0x3]  ;;  %v262_v2 = vld [vmem:[%s358_s0 + $0x28] sm:$0x3] }
   0x2   :  { %v226_v3 = vld [vmem:[%s358_s0 + $0xa] sm:$0x3]  ;;  %v228_v4 = vld [vmem:[%s358_s0 + $0xe] sm:$0x3]  ;;  %v232_v5 = vld [vmem:[%s358_s0 + $0x14] sm:$0x3]  ;;  %v274_v6 = vmul.f32 %v222_v1, %v254_v0  ;;  %v68_v17 = vsub.f32 %v262_v2, %v222_v1 }
   0x3   :  { %v29_v7 = vsub.f32 %v228_v4, %v226_v3  ;;  %v234_v8 = vld [vmem:[%s358_s0 + $0x18] sm:$0x3]  ;;  %v221_v9 = vld [vmem:[%s358_s0 + $0x22] sm:$0x3]  ;;  %v285_v10 = vld [vmem:[%s358_s0 + $0x26] sm:$0x3] }
   0x4   :  { %v47_v11 = vsub.f32 %v234_v8, %v232_v5  ;;  %v164_v12 = vsel %vm122_vm0, %v274_v6, 0.0  ;;  %v225_v13 = vld [vmem:[%s358_s0 + $0x8] sm:$0x3]  ;;  %v227_v14 = vld [vmem:[%s358_s0 + $0xc] sm:$0x3]  ;;  %v296_v15 = vmul.f32 %v221_v9, %v254_v0  ;;  %v67_v23 = vsub.f32 %v285_v10, %v221_v9 }
   0x5   :  { %v30_v16 = vmul.f32 0.5, %v29_v7  ;;  %165 = vadd.xlane.f32.xlu1 %v164_v12  ;;  %v26_v18 = vsub.f32 %v227_v14, %v225_v13  ;;  %v231_v19 = vld [vmem:[%s358_s0 + $0x12] sm:$0x3]  ;;  %v233_v20 = vld [vmem:[%s358_s0 + $0x16] sm:$0x3] }
   0x6   :  { %v48_v21 = vmul.f32 0.5, %v47_v11  ;;  %v44_v22 = vsub.f32 %v233_v20, %v231_v19  ;;  %v161_v24 = vsel %vm122_vm0, %v296_v15, 0.0  ;;  %v69_v35 = vmul.f32 %v68_v17, %v67_v23  ;;  %v237_v17 = vld [vmem:[%s358_s0 + $0x10] sm:$0x3] }
   0x7   :  { %v31_v25 = vadd.f32 %v226_v3, %v30_v16  ;;  %v27_v26 = vmul.f32 0.5, %v26_v18  ;;  %162 = vadd.xlane.f32.xlu0 %v161_v24  ;;  %v238_v18 = vld [vmem:[%s358_s0 + $0x6] sm:$0x3] }
   0x8   :  { %v49_v27 = vadd.f32 %v232_v5, %v48_v21  ;;  %v45_v28 = vmul.f32 0.5, %v44_v22  ;;  %v70_v57 = vand.u32 2147483647, %v69_v35 }
   0x9   :  { %v230_v29 = vadd.f32 -0.125, %v31_v25  ;;  %v35_v30 = vadd.f32 0.125, %v31_v25  ;;  %v28_v31 = vadd.f32 %v225_v13, %v27_v26 }
   0xa   :  { %v236_v32 = vadd.f32 -0.125, %v49_v27  ;;  %v53_v33 = vadd.f32 0.125, %v49_v27  ;;  %v46_v34 = vadd.f32 %v231_v19, %v45_v28  ;;  %v109_v27 = vmul.f32 %v262_v2, %v254_v0 }
   0xb   :  { %v55_v36 = vmax.f32 %v230_v29, %v222_v1  ;;  %v57_v37 = vmin.f32 %v35_v30, %v262_v2  ;;  %v229_v38 = vadd.f32 -0.125, %v28_v31  ;;  %v34_v39 = vadd.f32 0.125, %v28_v31 }
   0xc   :  { %v75_v40 = vmax.f32 %v236_v32, %v222_v1  ;;  %v77_v41 = vmin.f32 %v53_v33, %v262_v2  ;;  %v235_v42 = vadd.f32 -0.125, %v46_v34  ;;  %v52_v43 = vadd.f32 0.125, %v46_v34 }
   0xd   :  { %v60_v44 = vsub.f32 %v57_v37, %v55_v36  ;;  %v54_v45 = vmax.f32 %v229_v38, %v221_v9  ;;  %v56_v46 = vmin.f32 %v34_v39, %v285_v10  ;;  %v63_v47 = vsub.f32 %v34_v39, %v229_v38 }
   0xe   :  { %v80_v48 = vsub.f32 %v77_v41, %v75_v40  ;;  %v74_v49 = vmax.f32 %v235_v42, %v221_v9  ;;  %v64_v50 = vsub.f32 %v35_v30, %v230_v29  ;;  %v76_v51 = vmin.f32 %v52_v43, %v285_v10 }
   0xf   :  { %v61_v52 = vmax.f32 %v60_v44, 0.0  ;;  %v58_v53 = vsub.f32 %v56_v46, %v54_v45  ;;  %v83_v54 = vsub.f32 %v52_v43, %v235_v42  ;;  %v84_v55 = vsub.f32 %v53_v33, %v236_v32 }
  0x10   :  { %v81_v56 = vmax.f32 %v80_v48, 0.0  ;;  %v65_v58 = vmul.f32 %v64_v50, %v63_v47  ;;  %v78_v59 = vsub.f32 %v76_v51, %v74_v49  ;;  %v108_v28 = vmul.f32 %v285_v10, %v254_v0 }
  0x11   :  { %v59_v60 = vmax.f32 %v58_v53, 0.0  ;;  %v85_v61 = vmul.f32 %v84_v55, %v83_v54 }
  0x12   :  { %v66_v62 = vand.u32 2147483647, %v65_v58  ;;  %v79_v63 = vmax.f32 %v78_v59, 0.0 }
  0x13   :  { %v62_v1 = vmul.f32 %v61_v52, %v59_v60  ;;  %v86_v3 = vand.u32 2147483647, %v85_v61 }
  0x14   :  { %v71_v4 = vadd.f32 %v70_v57, %v66_v62  ;;  %v82_v5 = vmul.f32 %v81_v56, %v79_v63 }
  0x15   :  { %v87_v7 = vadd.f32 %v86_v3, %v70_v57 }
  0x16   :  { %v72_v8 = vsub.f32 %v71_v4, %v62_v1 }
  0x17   :  { %v88_v9 = vsub.f32 %v87_v7, %v82_v5 }
  0x18   :  { %v73_v11 = vadd.f32 1e-06, %v72_v8 }
  0x19   :  { %v89_v12 = vadd.f32 1e-06, %v88_v9 }
  0x1a   :  { %v90_v13 = vmul.f32 %v82_v5, %v73_v11 }
  0x1b   :  { %v91_v14 = vmul.f32 %v89_v12, %v62_v1 }
  0x1d   :  { %vm312_vm1 = vcmp.gt.f32.partialorder %v90_v13, %v91_v14 }
  0x1e   :  { %v95_v19 = vsel %vm312_vm1, %v52_v43, %v34_v39  ;;  %v93_v20 = vsel %vm312_vm1, %v235_v42, %v229_v38  ;;  %v96_v21 = vsel %vm312_vm1, %v53_v33, %v35_v30  ;;  %v94_v22 = vsel %vm312_vm1, %v236_v32, %v230_v29 }
  0x1f   :  { %v104_v23 = vmul.f32 %v254_v0, %v95_v19  ;;  %v102_v24 = vmul.f32 %v254_v0, %v93_v20  ;;  %v105_v25 = vmul.f32 %v254_v0, %v96_v21  ;;  %v103_v26 = vmul.f32 %v254_v0, %v94_v22 }
  0x20   :  { %v101_v30 = vsel %vm312_vm1, %v237_v17, %v238_v18  ;;  %v170_v42 = vsel %vm122_vm0, %v109_v27, 0.0 }
  0x21   :  { %v155_v31 = vsel %vm122_vm0, %v104_v23, 0.0  ;;  %v149_v29 = vsel %vm122_vm0, %v102_v24, 0.0  ;;  %v110_v32 = vsub.f32 %v102_v24, %v296_v15  ;;  %v113_v33 = vsub.f32 %v103_v26, %v274_v6 }
  0x22   :  { %156 = vadd.xlane.f32.xlu1 %v155_v31  ;;  %150 = vadd.xlane.f32.xlu0 %v149_v29  ;;  %v119_v34 = vsub.f32 %v105_v25, %v109_v27  ;;  %v116_v35 = vsub.f32 %v104_v23, %v108_v28  ;;  %v158_v2 = vsel %vm122_vm0, %v105_v25, 0.0  ;;  %v152_v10 = vsel %vm122_vm0, %v103_v26, 0.0 }
  0x23   :  { %v111_v36 = vmul.f32 %v110_v32, %v110_v32  ;;  %v135_v37 = vsub.f32 %v101_v30, %v254_v0  ;;  %v114_v38 = vmul.f32 %v113_v33, %v113_v33  ;;  %v167_v6 = vsel %vm122_vm0, %v108_v28, 0.0 }
  0x24   :  { %v117_v39 = vmul.f32 %v116_v35, %v116_v35  ;;  %v120_v41 = vmul.f32 %v119_v34, %v119_v34  ;;  %v207_v34 = vlaneseq }
  0x25   :  { %v136_v40 = vmul.f32 %v254_v0, %v135_v37  ;;  %v115_v15 = vadd.f32 %v114_v38, %v111_v36 }
  0x26   :  { %159 = vadd.xlane.f32.xlu1 %v158_v2  ;;  %153 = vadd.xlane.f32.xlu0 %v152_v10  ;;  %v208_v37 = vand.u32 127, %v207_v34 }
  0x27   :  { %v137_v43 = vmul.f32 %v136_v40, %v136_v40  ;;  %v118_v44 = vadd.f32 %v117_v39, %v115_v15 }
  0x28   :  { %vm209_vm5 = vcmp.eq.s32.totalorder %v208_v37, 0  ;;  %vm211_vm6 = vcmp.eq.s32.totalorder %v208_v37, 1  ;;  %vm213_vm7 = vcmp.eq.s32.totalorder %v208_v37, 2 }
  0x29   :  { %v121_v45 = vadd.f32 %v120_v41, %v118_v44  ;;  %v138_v46 = vsel %vm122_vm0, %v137_v43, 0.0 }
  0x2a   :  { %171 = vadd.xlane.f32.xlu1 %v170_v42  ;;  %168 = vadd.xlane.f32.xlu0 %v167_v6 }
  0x2b   :  { %v123_v47 = vsel %vm122_vm0, %v121_v45, 0.0 }
  0x2e   :  { %124 = vadd.xlane.f32.xlu0 %v123_v47  ;;  %139 = vadd.xlane.f32.xlu1 %v138_v46 }
  0x92   :  { %v166_v0 = vpop.xlane.xlu1 %165 }
  0x94   :  { %v163_v48 = vpop.xlane.xlu0 %162 }
  0xaf   :  { %v157_v49 = vpop.xlane.xlu1 %156  ;;  %v151_v50 = vpop.xlane.xlu0 %150 }
  0xb0   :  { %v173_v53 = vsub.f32 %v157_v49, %v151_v50 }
  0xb2   :  { %v174_v57 = vmul.f32 0.5, %v173_v53 }
  0xb3   :  { %v160_v51 = vpop.xlane.xlu1 %159  ;;  %v154_v52 = vpop.xlane.xlu0 %153 }
  0xb4   :  { %v176_v54 = vsub.f32 %v160_v51, %v154_v52  ;;  %v175_v63 = vadd.f32 %v174_v57, %v151_v50 }
  0xb6   :  { %v177_v58 = vmul.f32 0.5, %v176_v54 }
  0xb7   :  { %v172_v55 = vpop.xlane.xlu1 %171  ;;  %v169_v56 = vpop.xlane.xlu0 %168 }
  0xb8   :  { %v182_v59 = vsub.f32 %v172_v55, %v166_v0  ;;  %v179_v60 = vsub.f32 %v169_v56, %v163_v48  ;;  %v178_v1 = vadd.f32 %v177_v58, %v154_v52 }
  0xba   :  { %v183_v61 = vmul.f32 0.5, %v182_v59  ;;  %v180_v62 = vmul.f32 0.5, %v179_v60 }
  0xbb   :  { %v125_v8 = vpop.xlane.xlu0 %124  ;;  %v140_v13 = vpop.xlane.xlu1 %139 }
  0xbc   :  { %v184_v3 = vadd.f32 %v183_v61, %v166_v0  ;;  %v181_v4 = vadd.f32 %v180_v62, %v163_v48  ;;  %v127_v12 = vsel %vm126_vm2, %v125_v8, 0.0  ;;  %v141_v19 = vsel %vm126_vm2, %v140_v13, 0.0 }
  0xbd   :  { %v128_v18 = vrot.slane %v127_v12, 4  ;;  %v142_v20 = vrot.slane %v141_v19, 4 }
  0xbe   :  { %v187_v5 = vsub.f32 %v178_v1, %v184_v3  ;;  %v185_v7 = vsub.f32 %v175_v63, %v181_v4 }
  0xbf   :  { %v129_v21 = vadd.f32 %v128_v18, %v127_v12  ;;  %v143_v22 = vadd.f32 %v142_v20, %v141_v19 }
  0xc0   :  { %v188_v9 = vadd.f32 1e-06, %v187_v5  ;;  %v186_v11 = vadd.f32 1e-06, %v185_v7 }
  0xc1   :  { %v130_v23 = vrot.slane %v129_v21, 2  ;;  %v144_v24 = vrot.slane %v143_v22, 2 }
  0xc2   :  { %v190_v14 = vmul.f32 %v188_v9, %v188_v9  ;;  %v189_v16 = vmul.f32 %v186_v11, %v186_v11 }
  0xc3   :  { %v131_v26 = vadd.f32 %v130_v23, %v129_v21  ;;  %v145_v31 = vadd.f32 %v144_v24, %v143_v22 }
  0xc4   :  { %v191_v17 = vadd.f32 %v190_v14, %v189_v16 }
  0xc5   :  { %v132_v32 = vrot.slane %v131_v26, 1  ;;  %v146_v36 = vrot.slane %v145_v31, 1 }
  0xc6   :  { %239 = vrsqrt.f32 %v191_v17  ;;  %vm194_vm3 = vcmp.eq.f32.partialorder %v191_v17, inf  ;;  %v197_v28 = vand.u32 2147483648, %v191_v17  ;;  %vm196_vm4 = vcmp.eq.f32.partialorder %v191_v17, 0.0 }
  0xc7   :  { %v133_v10 = vadd.f32 %v132_v32, %v131_v26  ;;  %v147_v39 = vadd.f32 %v146_v36, %v145_v31 }
  0xc9   :  { %v134_v15 = vmul.f32 0.15625, %v133_v10  ;;  %v148_v42 = vmul.f32 0.015625, %v147_v39 }
  0xcb   :  { %v210_v43 = vsel %vm209_vm5, %v134_v15, 0.0 }
  0xcc   :  { %v212_v45 = vsel %vm211_vm6, %v148_v42, %v210_v43 }
  0xd0   :  { %v240_v25 = vpop.eup %239 }
  0xd1   :  { %v193_v27 = vmul.f32 %v240_v25, %v191_v17 }
  0xd3   :  { %v195_v30 = vsel %vm194_vm3, %v191_v17, %v193_v27 }
  0xd4   :  { %v198_v29 = vsel %vm196_vm4, %v197_v28, %v195_v30 }
  0xd5   :  { %v199_v33 = vsel %vm126_vm2, %v198_v29, 0.0 }
  0xd6   :  { %v200_v35 = vrot.slane %v199_v33, 4 }
  0xd8   :  { %v201_v2 = vadd.f32 %v200_v35, %v199_v33 }
  0xda   :  { %v202_v38 = vrot.slane %v201_v2, 2 }
  0xdc   :  { %v203_v40 = vadd.f32 %v202_v38, %v201_v2 }
  0xde   :  { %v204_v41 = vrot.slane %v203_v40, 1 }
  0xe0   :  { %v205_v6 = vadd.f32 %v204_v41, %v203_v40 }
  0xe2   :  { %v206_v44 = vmul.f32 0.5, %v205_v6 }
  0xe4   :  { %v214_v46 = vsel %vm213_vm7, %v206_v44, %v212_v45 }
  0xe5   :  { %215 = vst [vmem:[%s359_s1] sm:$0x1] %v214_v46 }

</bundles_post_ra>
